<compile_context>
chip_gen: v7x
topology: tpu7x:2x2x1
jax: 0.10.0
libtpu: 0.0.40
codegen_flags: <defaults>
</compile_context>

<pallas_src>
import functools

import jax
import jax.numpy as jnp
from jax.experimental import pallas as pl
from jax.experimental.pallas import tpu as pltpu


def _round_up(x, mult):
    return ((x + mult - 1) // mult) * mult


def _pick_lane_tile(hw, cap=2048):
    """Spatial (lane) tile: a 128-multiple (or the full extent) <= cap."""
    if hw % 128 != 0 and hw <= cap:
        # Awkward small spatial extents: take the whole axis per block
        # (block dim == full array dim is always legal).
        return hw
    hw128 = _round_up(hw, 128)
    q = hw128 // 128
    best = 128
    for d in range(1, q + 1):
        if q % d == 0 and d * 128 <= cap:
            best = max(best, d * 128)
    # Divides round_up(hw, 128): boundary overhang is <= 127 lanes, and the
    # cdiv grid clips it so no HBM bytes are wasted.
    return best


def _tiling_budget():
    """(target output-tile bytes, vmem_limit_bytes) per TPU generation."""
    kind = ""
    try:
        kind = jax.devices()[0].device_kind.lower()
    except Exception:
        pass
    if "v7" in kind:
        # 64 MiB physical VMEM per TC: ~12 MiB tile double-buffered + input.
        return 12 << 20, 40 << 20
    if "v6" in kind or "v5p" in kind:
        # 128 MiB physical VMEM: 8 MiB tile; raise the scoped limit for headroom.
        return 8 << 20, 48 << 20
    # v5e / unknown: stay near the 16 MiB default-scoped regime (still safe,
    # explicit limit gives double-buffer headroom; physical VMEM is 128 MiB).
    return 4 << 20, 24 << 20


def _onehot_kernel(x_ref, o_ref, *, m):
    # x_ref : (bn, thw) float32
    # o_ref : (bn, m, thw) out_dtype
    x = x_ref[...]
    # clamp(x*m, 0, m-1) then truncate toward zero.  Truncation matches
    # torch's .long() (floor) here because the clamp guarantees non-negative
    # values; NaN inputs give an undefined class in both implementations.
    idx = jnp.clip(x * float(m), 0.0, float(m - 1)).astype(jnp.int32)
    # Tiny (1, m, 1) iota — a single vreg; broadcasting happens inside the
    # compare, so no full (bn, m, thw) int32 iota is ever materialized.
    k = jax.lax.broadcasted_iota(jnp.int32, (1, m, 1), 1)
    o_ref[...] = (idx[:, None, :] == k).astype(o_ref.dtype)


def onehot_forward(x, m=32, out_dtype=jnp.bfloat16):
    """x: (B, C, H, W) float -> (B, C*M, H, W) out_dtype (default bfloat16).

    One-hot values (0.0 / 1.0) are exact in bfloat16, so bf16 halves the
    HBM-write traffic of this write-bound kernel at no accuracy cost.
    Pass out_dtype=jnp.float32 for bit-exact parity with the PyTorch module.
    """
    b, c, h, w = x.shape
    n = b * c
    hw = h * w
    elem_bytes = jnp.dtype(out_dtype).itemsize

    target_out_bytes, vmem_limit = _tiling_budget()

    # ---- tiling (cdiv grid on exact shapes: no input pad, no output slice) --
    thw = _pick_lane_tile(hw)
    # Row tile: multiple of 8, sized so one output tile hits the per-generation
    # VMEM budget (amortizes the ~0.35 us/step pipeline overhead).
    rows_budget = max(8, (target_out_bytes // (m * thw * elem_bytes)) // 8 * 8)
    bn = int(min(rows_budget, _round_up(n, 8)))
    if n < 8:
        bn = n  # block dim == full array dim (legal even when not 8-aligned)

    # Megacore: make sure at least two grid programs exist on small shapes so
    # v7x's two TensorCores both get work.
    for _ in range(2):
        if pl.cdiv(n, bn) * pl.cdiv(hw, thw) >= 2:
            break
        if thw % 256 == 0:
            thw //= 2
        elif bn >= 16 and bn % 8 == 0:
            bn = ((bn // 2 + 7) // 8) * 8
        else:
            break

    grid = (pl.cdiv(n, bn), pl.cdiv(hw, thw))

    x2 = x.reshape(n, hw).astype(jnp.float32)

    # Unpadded traffic estimate: tiny input read + 32x-amplified output write.
    cost = pl.CostEstimate(
        flops=n * m * hw,
        transcendentals=0,
        bytes_accessed=n * hw * 4 + n * m * hw * elem_bytes,
    )

    out = pl.pallas_call(
        functools.partial(_onehot_kernel, m=m),
        out_shape=jax.ShapeDtypeStruct((n, m, hw), out_dtype),
        grid_spec=pltpu.PrefetchScalarGridSpec(
            num_scalar_prefetch=0,
            grid=grid,
            in_specs=[pl.BlockSpec((bn, thw), lambda i, j: (i, j))],
            out_specs=pl.BlockSpec((bn, m, thw), lambda i, j: (i, 0, j)),
        ),
        compiler_params=pltpu.CompilerParams(
            dimension_semantics=("parallel", "parallel"),
            vmem_limit_bytes=vmem_limit,
        ),
        cost_estimate=cost,
    )(x2)

    # (B*C, M, H*W) -> (B, C*M, H, W); channel layout c*m + k matches the
    # torch permute(0, 1, -1, 2, 3).reshape(...).
    return out.reshape(b, c * m, h, w)


def onehot_reference(x, m=32):
    """Pure-JAX reference mirroring the PyTorch forward (incl. identity embedding)."""
    b, c, h, w = x.shape
    embedding = jnp.eye(m, dtype=jnp.float32)          # deterministic buffer init
    idx = jnp.clip(x * m, 0, m - 1).astype(jnp.int32)
    oh = embedding[idx.reshape(-1)]                    # (b*c*h*w, m)
    oh = oh.reshape(b, c, h, w, m).transpose(0, 1, 4, 2, 3)
    return oh.reshape(b, c * m, h, w)


if __name__ == "__main__":
    M = 32
    B, C, H, W = 2, 4, 16, 16
    key = jax.random.PRNGKey(0)
    # values in [-0.25, 1.25] so clamping on both ends is exercised
    x = jax.random.uniform(key, (B, C, H, W), dtype=jnp.float32,
                           minval=-0.25, maxval=1.25)

    y_ref = onehot_reference(x, m=M)

    # Default bf16 output (write-bound kernel -> half the HBM bytes); exact values.
    y = jax.block_until_ready(onehot_forward(x, m=M))
    assert y.shape == (B, C * M, H, W), y.shape
    assert y.dtype == jnp.bfloat16, y.dtype
    assert jnp.array_equal(y.astype(jnp.float32), y_ref), "bf16 output mismatch"

    # f32 path for bit-exact parity with the PyTorch module.
    y32 = jax.block_until_ready(onehot_forward(x, m=M, out_dtype=jnp.float32))
    assert jnp.array_equal(y32, y_ref), "f32 output mismatch"

    print("KERNEL_OK")
</pallas_src>

<mosaic_0001>
module attributes {stable_mosaic.version = 11 : i64} {
  func.func @_onehot_kernel(%arg0: i32, %arg1: i32, %arg2: memref<8x128xf32, #tpu.memory_space<vmem>>, %arg3: memref<8x32x128xbf16, #tpu.memory_space<vmem>>) attributes {dimension_semantics = [#tpu.dimension_semantics<parallel>, #tpu.dimension_semantics<parallel>], iteration_bounds = array<i64: 1, 2>, scalar_prefetch = 0 : i64, scratch_operands = 0 : i64, tpu.core_type = #tpu.core_type<tc>, window_params = [{transform_indices = @transform_0, window_bounds = array<i64: 8, 128>}, {transform_indices = @transform_1, window_bounds = array<i64: 8, 32, 128>}]} {
    %c0 = arith.constant 0 : index
    %c0_0 = arith.constant 0 : index
    %0 = vector.load %arg2[%c0, %c0_0] : memref<8x128xf32, #tpu.memory_space<vmem>>, vector<8x128xf32>
    %cst = arith.constant 3.200000e+01 : f32
    %1 = vector.broadcast %cst : f32 to vector<8x128xf32>
    %2 = arith.mulf %0, %1 : vector<8x128xf32>
    %cst_1 = arith.constant 0.000000e+00 : f32
    %cst_2 = arith.constant 3.100000e+01 : f32
    %3 = vector.broadcast %cst_1 : f32 to vector<8x128xf32>
    %4 = arith.maximumf %3, %2 : vector<8x128xf32>
    %5 = vector.broadcast %cst_2 : f32 to vector<8x128xf32>
    %6 = arith.minimumf %5, %4 : vector<8x128xf32>
    %7 = arith.fptosi %6 : vector<8x128xf32> to vector<8x128xi32>
    %8 = tpu.iota {dimensions = array<i32: 1>} : vector<1x32x1xi32>
    %9 = vector.shape_cast %7 : vector<8x128xi32> to vector<8x1x128xi32>
    %10 = vector.broadcast %9 : vector<8x1x128xi32> to vector<8x32x128xi32>
    %11 = vector.broadcast %8 : vector<1x32x1xi32> to vector<8x32x128xi32>
    %12 = arith.cmpi eq, %10, %11 : vector<8x32x128xi32>
    %13 = arith.extui %12 : vector<8x32x128xi1> to vector<8x32x128xi32>
    %14 = arith.sitofp %13 : vector<8x32x128xi32> to vector<8x32x128xf32>
    %15 = arith.truncf %14 : vector<8x32x128xf32> to vector<8x32x128xbf16>
    %c0_3 = arith.constant 0 : index
    %c0_4 = arith.constant 0 : index
    %c0_5 = arith.constant 0 : index
    %16 = vector.load %arg3[%c0_3, %c0_4, %c0_5] : memref<8x32x128xbf16, #tpu.memory_space<vmem>>, vector<8x32x128xbf16>
    tpu.vector_store %arg3[%c0_3, %c0_4, %c0_5], %15 {strides = array<i32>} : memref<8x32x128xbf16, #tpu.memory_space<vmem>>, vector<8x32x128xbf16>,
    return
  }
  func.func @transform_0(%arg0: i32, %arg1: i32) -> (i32, i32) {
    %c0_i32 = arith.constant 0 : i32
    return %arg0, %arg1 : i32, i32
  }
  func.func @transform_1(%arg0: i32, %arg1: i32) -> (i32, i32, i32) {
    %c0_i32 = arith.constant 0 : i32
    %c0_i32_0 = arith.constant 0 : i32
    return %arg0, %c0_i32, %arg1 : i32, i32, i32
  }
}

</mosaic_0001>

<bundles_post_ra>
// kernel: tpu_custom_call.1
= control target key start
LH: loop header
LB: loop body
LE: loop exit
PB: predicated region body
PF: predicated region fallthrough
CT: control target
= control target key end

     0   :  { %6 = vsyncpa [#allocation3], 0  ;;  %s1264_s0 = inlined_call_operand.hbm [shape: f32[8,256], index: 0, kind: input, shape index: {}]   ;;  %s1265_s1 = inlined_call_operand.hbm [shape: bf16[8,32,256], index: 1, kind: output, shape index: {}]  }
   0x1   :  { %8 = vsyncpa [#allocation3 + $0x1], 0 }
   0x2   :  { %9 = vsyncpa [#allocation4], 0 }
   0x3   :  { %11 = vsyncpa [#allocation4 + $0x1], 0  ;;  %s971_s6 = smov 0   ;;  %s973_s7 = smov 0  }
   0x4   :  { %s975_s8 = smov 0   ;;  %s977_s9 = smov 0  }
   0x5   :  { %s979_s10 = smov 0   ;;  %s981_s11 = smov 0  }
   0x6 LB: > { %s599_s12 = sadd.s32 4294967295, %s952_s11   ;;  %s600_s13 = sadd.s32 4294967294, %s952_s11   ;;  %s952_s11 = sphi %s981_s11, %s17_s11   ;;  %s948_s10 = sphi %s979_s10, %s1281_s10   ;;  %s944_s9 = sphi %s977_s9, %s1280_s9   ;;  %s940_s8 = sphi %s975_s8, %s1279_s8   ;;  %s936_s7 = sphi %s973_s7, %s1278_s7   ;;  %s932_s6 = sphi %s971_s6, %s1277_s6  }
   0x7   : > { %s26_s14 = sadd.s32 1, %s948_s10  ;;  %s38_s15 = sadd.s32 1, %s940_s8 }
   0x8   : > { %p27_p0 = scmp.ge.s32.totalorder %s26_s14, 2  ;;  %p45_p1 = scmp.ne.s32.totalorder %s940_s8, %s936_s7 }
   0x9   : > { %p46_p2 = scmp.eq.s32.totalorder %s952_s11, 0  ;;  %p51_p3 = scmp.ne.s32.totalorder %s936_s7, %s932_s6 }
   0xa   : > { %s1283_s14 = smov (%p27_p0, %s26_s14), 0  ;;  %p52_p5 = scmp.eq.s32.totalorder %s599_s12, 0 }
   0xb   : > { %p1012_p4 = por %p46_p2, %p45_p1  ;;  %s34_s17 = ssub.s32 %s948_s10, %s1283_s14 }
   0xc   : > { %p77_p6 = scmp.eq.s32.totalorder %s599_s12, 1  ;;  %p36_p7 = scmp.eq.s32.totalorder %s34_s17, 0 }
   0xd   : > { %p1018_p8 = por %p52_p5, %p51_p3  ;;  %p83_p10 = scmp.eq.s32.totalorder %s600_s13, 1 }
   0xe   : > { %p1022_p9 = por %p77_p6, %p45_p1  ;;  %p785_p13 = scmp.lt.s32.totalorder %s952_s11, 2 }
   0xf   : > { %s1027_s20 = scalar_select %p36_p7, %s940_s8, %s38_s15  }
  0x10   : > { %s1269_s19 = scalar_select %p1022_p9, 1, 0 }
  0x11   : > { %p1029_p11 = por %p83_p10, %p51_p3  ;;  %s103_s22 = sand.u32 1, %s940_s8  }
  0x12   : > { %s603_s23 = sshll.u32 %s103_s22, 3  ;;  %s604_s24 = sshll.u32 %s948_s10, 7 }
  0x13   : > { %s1270_s21 = scalar_select %p1029_p11, 1, 0 }
  0x14   : > { %s1040_s27 = scalar_lea.hbm %s1264_s0, %s604_s24  ;;  %s107_s28 = scalar_lea.vmem [#allocation2], %s603_s23 }
  0x15   : > { %s116_s29 = sshll.u32 %s107_s28, 4  ;;  %p1046_p0 = pnand %p785_p13, %p1012_p4  ;;  %s1042_s29 = int_to_ptr.vmem [resolvable:$true] %s116_s29 }
  0x16   : > { %s104_s2 = scalar_lea.sflag [#allocation3], %s103_s22  ;;  %s840_s3 = scalar_lea.hbm %s1040_s27, 128 }
  0x17   : > { %p841_p3 = scmp.ne.s32.totalorder %s1040_s27, %s840_s3  ;;  %p842_p5 = pneg %p1046_p0 }
  0x18   : > { %s845_s12 = scalar_lea.hbm %s1264_s0, 256  ;;  %p846_p4 = scmp.lt.u32.totalorder %s1040_s27, %s1264_s0 }
  0x19   : > { %p843_p6 = pnand %p842_p5, %p841_p3  ;;  %p847_p10 = scmp.lt.u32.totalorder %s845_s12, %s840_s3 }
  0x1a   : > { %p849_p12 = scmp.lt.u32.totalorder %s840_s3, %s1040_s27 }
  0x1b   : > { %p844_p7 = pneg %p843_p6  ;;  %p848_p13 = por %p847_p10, %p846_p4 }
  0x1d   : > { %p850_p1 = por %p849_p12, %p848_p13 }
  0x1f   : > { %p851_p2 = pnand %p850_p1, %p844_p7 }
  0x21   : > { %854 = shalt.err (!%p851_p2)
}
  0x22   : > { %s855_s16 = scalar_lea.vmem %s1042_s29, 128  ;;  %s954_s17 = smov [#allocation2]  }
  0x23   : > { %p856_p3 = scmp.ne.s32.totalorder %s1042_s29, %s855_s16  ;;  %s860_s22 = sshll.u32 %s954_s17, 4  ;;  %s861_s22 = int_to_ptr.vmem [resolvable:$false] %s860_s22 }
  0x24   : > { %s862_s23 = scalar_lea.vmem %s861_s22, 256  ;;  %p863_p9 = scmp.lt.s32.totalorder %s1042_s29, %s861_s22 }
  0x25   : > { %p858_p6 = pnand %p856_p3, %p842_p5  ;;  %p864_p4 = scmp.lt.s32.totalorder %s862_s23, %s855_s16 }
  0x27   : > { %p859_p11 = pneg %p858_p6  ;;  %p865_p10 = por %p864_p4, %p863_p9 }
  0x29   : > { %p866_p12 = pnand %p865_p10, %p859_p11 }
  0x2b   : > { %869 = shalt.err (!%p866_p12)
}
  0x2c   : > { %780 = dma.hbm_to_vmem [thread:$0]  (!%p1046_p0), %s1040_s27, 128, %s1042_s29, %s104_s2  }
  0x2d   : > { %p1272_p1 = scmp.lt.s32.totalorder %s952_s11, 3  ;;  %p1273_p2 = scmp.ge.s32.totalorder %s952_s11, 1 }
  0x2f   : > { %p122_p5 = pnand %p1273_p2, %p1272_p1 }
  0x30   : > { %s1082_s24 = sand.u32 (!%p122_p5), 1, %s936_s7  }
  0x31   : > { %125 = sbr.rel (%p122_p5) target bundleno = 116 (0x74), region = 24  ;;  %s606_s25 = sshll.u32 (!%p122_p5), %s1082_s24, 3 }
  0x32   : > { %s128_s26 = scalar_lea.sflag (!%p122_p5), [#allocation3], %s1082_s24  ;;  %s131_s28 = scalar_lea.vmem (!%p122_p5), [#allocation2], %s606_s25 }
  0x38   : > { %923 = dma.done.wait (%p1018_p8), %s128_s26, 128  }
  0x39   : > { %925 = vsyncadd (%p1018_p8), %s128_s26, 4294967168  ;;  %v156_v0 = vlaneseq  ;;  %v955_v1 = vmov 1966171168   ;;  %v151_v3 = vld [vmem:[%s131_s28] sm:$0xff]  ;;  %s607_s18 = sshll.u32 %s1082_s24, 7  ;;  %v956_v26 = vmov 0.0  }
  0x3a   : > { %v163_v2 = vunpack.c.l.s4 %v955_v1  ;;  %v152_v4 = vmul.f32 32.0, %v151_v3  ;;  %s1125_s27 = scalar_lea.vmem [#allocation5], %s607_s18  ;;  %s673_s29 = sshll.u32 %s944_s9, 6 }
  0x3b   : > { %v1090_v6 = vshrl.u32 %v156_v0, 7  ;;  %s514_s30 = sshll.u32 %s1125_s27, 4  ;;  %s1209_s3 = scalar_lea.hbm %s1265_s1, %s673_s29  ;;  %s1213_s30 = int_to_ptr.vmem [resolvable:$true] %s514_s30 }
  0x3c   : > { %v153_v5 = vmax.f32 %v152_v4, 0.0  ;;  %v164_v7 = vunpack.c.0.s8 %v163_v2  ;;  %s499_s4 = scalar_lea.sflag [#allocation4], %s1082_s24  ;;  %s870_s5 = scalar_lea.vmem %s1213_s30, 2048 }
  0x3d   : > { %v1094_v13 = vsub.s32 0, %v1090_v6  ;;  %v1097_v15 = vadd.s32 8, %v1090_v6  ;;  %v1100_v16 = vadd.s32 16, %v1090_v6  ;;  %v1103_v18 = vadd.s32 24, %v1090_v6  ;;  %p871_p8 = scmp.ne.s32.totalorder %s1213_s30, %s870_s5  ;;  %p1274_p9 = scmp.ne.s32.totalorder %s1269_s19, 0 }
  0x3e   : > { %v154_v8 = vmin.f32 %v153_v5, 31.0  ;;  %v167_v10 = vsub.s32 %v164_v7, %v1090_v6  ;;  %s957_s12 = smov [#allocation5]  }
  0x3f   : > { %p872_p11 = pnand %p871_p8, %p1274_p9  ;;  %s874_s13 = sshll.u32 %s957_s12, 4  ;;  %s875_s13 = int_to_ptr.vmem [resolvable:$false] %s874_s13 }
  0x40   : > { %v771_v9 = vtrunc.f32 %v154_v8  ;;  %s876_s15 = scalar_lea.vmem %s875_s13, 4096  ;;  %p877_p7 = scmp.lt.s32.totalorder %s1213_s30, %s875_s13 }
  0x41   : > { %p873_p0 = pneg %p872_p11  ;;  %p878_p13 = scmp.lt.s32.totalorder %s876_s15, %s870_s5 }
  0x42   : > { %v772_v11 = vcvt.f32.s32 %v771_v9 }
  0x43   : > { %p879_p3 = por %p878_p13, %p877_p7 }
  0x44   : > { %v168_v12 = vrot.slane %v772_v11, %v167_v10  ;;  %v161_v14 = vcombine.high %v772_v11, %v772_v11 }
  0x45   : > { %p880_p6 = pnand %p879_p3, %p873_p0 }
  0x46   : > { %v184_v17 = vrot.slane %v168_v12, %v167_v10  ;;  %v176_v19 = vcombine.high %v168_v12, %v168_v12  ;;  %v175_v20 = vrot.slane %v161_v14, %v167_v10 }
  0x48   : > { %v213_v21 = vrot.slane %v184_v17, %v1094_v13  ;;  %v206_v22 = vcombine.high %v184_v17, %v184_v17  ;;  %v198_v23 = vrot.slane %v176_v19, %v167_v10  ;;  %v1107_v24 = vrot.slane %v175_v20, %v167_v10 }
  0x49   : > { %v177_v25 = vcombine.high %v175_v20, %v175_v20 }
  0x4a   : > { %vm242_vm0 = vcmp.eq.s32.totalorder %v213_v21, %v1090_v6  ;;  %vm243_vm1 = vcmp.eq.s32.totalorder %v213_v21, %v1097_v15  ;;  %vm244_vm2 = vcmp.eq.s32.totalorder %v213_v21, %v1100_v16  ;;  %vm245_vm3 = vcmp.eq.s32.totalorder %v213_v21, %v1103_v18 }
  0x4b   : > { %v608_v27 = vsel %vm242_vm0, 1.0, %v956_v26  ;;  %v609_v28 = vsel %vm243_vm1, 1.0, %v956_v26  ;;  %v610_v29 = vsel %vm244_vm2, 1.0, %v956_v26  ;;  %v611_v30 = vsel %vm245_vm3, 1.0, %v956_v26 }
  0x4c   : > { %v709_v31 = vpack.c.bf16 %v609_v28, %v608_v27  ;;  %v712_v32 = vpack.c.bf16 %v611_v30, %v610_v29  ;;  %v217_v33 = vrot.slane %v198_v23, %v1094_v13  ;;  %v221_v34 = vrot.slane %v206_v22, %v1094_v13 }
  0x4d   : > { %v208_v35 = vcombine.high %v198_v23, %v198_v23  ;;  %v229_v36 = vrot.slane %v1107_v24, %v1094_v13  ;;  %v1121_v37 = vrot.slane %v177_v25, %v167_v10  ;;  %v207_v38 = vcombine.high %v1107_v24, %v1107_v24 }
  0x4e   : > { %710 = vst [vmem:[%s1125_s27] sm:$0xff] %v709_v31   ;;  %756 = vst [vmem:[%s1125_s27 + $0x8] sm:$0xff] %v712_v32   ;;  %vm246_vm4 = vcmp.eq.s32.totalorder %v217_v33, %v1090_v6  ;;  %vm247_vm5 = vcmp.eq.s32.totalorder %v217_v33, %v1097_v15  ;;  %vm248_vm6 = vcmp.eq.s32.totalorder %v217_v33, %v1100_v16 }
  0x4f   : > { %vm249_vm7 = vcmp.eq.s32.totalorder %v217_v33, %v1103_v18  ;;  %v612_v39 = vsel %vm246_vm4, 1.0, %v956_v26  ;;  %v613_v40 = vsel %vm247_vm5, 1.0, %v956_v26  ;;  %v614_v41 = vsel %vm248_vm6, 1.0, %v956_v26 }
  0x50   : > { %v615_v42 = vsel %vm249_vm7, 1.0, %v956_v26  ;;  %v715_v43 = vpack.c.bf16 %v613_v40, %v612_v39  ;;  %vm250_vm8 = vcmp.eq.s32.totalorder %v221_v34, %v1090_v6  ;;  %vm251_vm9 = vcmp.eq.s32.totalorder %v221_v34, %v1097_v15 }
  0x51   : > { %v718_v44 = vpack.c.bf16 %v615_v42, %v614_v41  ;;  %v616_v45 = vsel %vm250_vm8, 1.0, %v956_v26  ;;  %v617_v46 = vsel %vm251_vm9, 1.0, %v956_v26  ;;  %vm252_vm10 = vcmp.eq.s32.totalorder %v221_v34, %v1100_v16 }
  0x52   : > { %vm253_vm11 = vcmp.eq.s32.totalorder %v221_v34, %v1103_v18  ;;  %757 = vst [vmem:[%s1125_s27 + $0x10] sm:$0xff] %v715_v43   ;;  %v721_v47 = vpack.c.bf16 %v617_v46, %v616_v45  ;;  %v618_v48 = vsel %vm252_vm10, 1.0, %v956_v26  ;;  %v225_v50 = vrot.slane %v208_v35, %v1094_v13 }
  0x53   : > { %758 = vst [vmem:[%s1125_s27 + $0x18] sm:$0xff] %v718_v44   ;;  %v619_v49 = vsel %vm253_vm11, 1.0, %v956_v26  ;;  %vm258_vm12 = vcmp.eq.s32.totalorder %v229_v36, %v1090_v6  ;;  %vm259_vm13 = vcmp.eq.s32.totalorder %v229_v36, %v1097_v15  ;;  %vm260_vm14 = vcmp.eq.s32.totalorder %v229_v36, %v1100_v16 }
  0x54   : > { %v724_v51 = vpack.c.bf16 %v619_v49, %v618_v48  ;;  %759 = vst [vmem:[%s1125_s27 + $0x20] sm:$0xff] %v721_v47   ;;  %vm254_vm15 = vcmp.eq.s32.totalorder %v225_v50, %v1090_v6  ;;  %vm255_vm0 = vcmp.eq.s32.totalorder %v225_v50, %v1097_v15  ;;  %vm256_vm1 = vcmp.eq.s32.totalorder %v225_v50, %v1100_v16 }
  0x55   : > { %vm257_vm2 = vcmp.eq.s32.totalorder %v225_v50, %v1103_v18  ;;  %v620_v52 = vsel %vm254_vm15, 1.0, %v956_v26  ;;  %v621_v53 = vsel %vm255_vm0, 1.0, %v956_v26  ;;  %v622_v54 = vsel %vm256_vm1, 1.0, %v956_v26 }
  0x56   : > { %760 = vst [vmem:[%s1125_s27 + $0x28] sm:$0xff] %v724_v51   ;;  %v623_v55 = vsel %vm257_vm2, 1.0, %v956_v26  ;;  %v727_v56 = vpack.c.bf16 %v621_v53, %v620_v52  ;;  %v624_v58 = vsel %vm258_vm12, 1.0, %v956_v26  ;;  %v625_v59 = vsel %vm259_vm13, 1.0, %v956_v26 }
  0x57   : > { %v730_v57 = vpack.c.bf16 %v623_v55, %v622_v54  ;;  %v733_v60 = vpack.c.bf16 %v625_v59, %v624_v58  ;;  %vm261_vm3 = vcmp.eq.s32.totalorder %v229_v36, %v1103_v18  ;;  %v626_v61 = vsel %vm260_vm14, 1.0, %v956_v26 }
  0x58   : > { %v233_v62 = vrot.slane %v1121_v37, %v1094_v13  ;;  %761 = vst [vmem:[%s1125_s27 + $0x30] sm:$0xff] %v727_v56   ;;  %v627_v63 = vsel %vm261_vm3, 1.0, %v956_v26  ;;  %v237_v0 = vrot.slane %v207_v38, %v1094_v13  ;;  %v209_v1 = vcombine.high %v1121_v37, %v1121_v37 }
  0x59   : > { %762 = vst [vmem:[%s1125_s27 + $0x38] sm:$0xff] %v730_v57   ;;  %763 = vst [vmem:[%s1125_s27 + $0x40] sm:$0xff] %v733_v60   ;;  %v736_v2 = vpack.c.bf16 %v627_v63, %v626_v61 }
  0x5a   : > { %vm262_vm4 = vcmp.eq.s32.totalorder %v233_v62, %v1090_v6  ;;  %vm263_vm5 = vcmp.eq.s32.totalorder %v233_v62, %v1097_v15  ;;  %vm264_vm6 = vcmp.eq.s32.totalorder %v233_v62, %v1100_v16  ;;  %vm265_vm7 = vcmp.eq.s32.totalorder %v233_v62, %v1103_v18 }
  0x5b   : > { %v628_v3 = vsel %vm262_vm4, 1.0, %v956_v26  ;;  %v629_v4 = vsel %vm263_vm5, 1.0, %v956_v26  ;;  %v630_v5 = vsel %vm264_vm6, 1.0, %v956_v26  ;;  %764 = vst [vmem:[%s1125_s27 + $0x48] sm:$0xff] %v736_v2   ;;  %v631_v8 = vsel %vm265_vm7, 1.0, %v956_v26 }
  0x5c   : > { %v739_v7 = vpack.c.bf16 %v629_v4, %v628_v3  ;;  %vm266_vm8 = vcmp.eq.s32.totalorder %v237_v0, %v1090_v6  ;;  %vm267_vm9 = vcmp.eq.s32.totalorder %v237_v0, %v1097_v15  ;;  %v742_v9 = vpack.c.bf16 %v631_v8, %v630_v5 }
  0x5d   : > { %v632_v10 = vsel %vm266_vm8, 1.0, %v956_v26  ;;  %v633_v11 = vsel %vm267_vm9, 1.0, %v956_v26  ;;  %vm268_vm10 = vcmp.eq.s32.totalorder %v237_v0, %v1100_v16  ;;  %vm269_vm11 = vcmp.eq.s32.totalorder %v237_v0, %v1103_v18 }
  0x5e   : > { %765 = vst [vmem:[%s1125_s27 + $0x50] sm:$0xff] %v739_v7   ;;  %v745_v12 = vpack.c.bf16 %v633_v11, %v632_v10  ;;  %v634_v14 = vsel %vm268_vm10, 1.0, %v956_v26  ;;  %v241_v17 = vrot.slane %v209_v1, %v1094_v13  ;;  %766 = vst [vmem:[%s1125_s27 + $0x58] sm:$0xff] %v742_v9   ;;  %v635_v19 = vsel %vm269_vm11, 1.0, %v956_v26 }
  0x5f   : > { %v748_v20 = vpack.c.bf16 %v635_v19, %v634_v14 }
  0x60   : > { %767 = vst [vmem:[%s1125_s27 + $0x60] sm:$0xff] %v745_v12   ;;  %vm270_vm12 = vcmp.eq.s32.totalorder %v241_v17, %v1090_v6  ;;  %vm271_vm13 = vcmp.eq.s32.totalorder %v241_v17, %v1097_v15  ;;  %vm272_vm14 = vcmp.eq.s32.totalorder %v241_v17, %v1100_v16  ;;  %vm273_vm15 = vcmp.eq.s32.totalorder %v241_v17, %v1103_v18 }
  0x61   : > { %v636_v21 = vsel %vm270_vm12, 1.0, %v956_v26  ;;  %v637_v13 = vsel %vm271_vm13, 1.0, %v956_v26  ;;  %v638_v22 = vsel %vm272_vm14, 1.0, %v956_v26  ;;  %768 = vst [vmem:[%s1125_s27 + $0x68] sm:$0xff] %v748_v20   ;;  %v639_v15 = vsel %vm273_vm15, 1.0, %v956_v26 }
  0x62   : > { %v751_v6 = vpack.c.bf16 %v637_v13, %v636_v21  ;;  %v754_v16 = vpack.c.bf16 %v639_v15, %v638_v22 }
  0x64   : > { %769 = vst [vmem:[%s1125_s27 + $0x70] sm:$0xff] %v751_v6   ;;  %770 = vst [vmem:[%s1125_s27 + $0x78] sm:$0xff] %v754_v16  }
  0x65   : > { %883 = shalt.err (!%p880_p6)
}
  0x66   : > { %s884_s16 = scalar_lea.hbm %s1209_s3, 2048  ;;  %s888_s23 = scalar_lea.hbm %s1265_s1, 4096 }
  0x67   : > { %p885_p4 = scmp.ne.s32.totalorder %s1209_s3, %s884_s16  ;;  %p889_p1 = scmp.lt.u32.totalorder %s1209_s3, %s1265_s1 }
  0x68   : > { %p890_p2 = scmp.lt.u32.totalorder %s888_s23, %s884_s16  ;;  %p892_p8 = scmp.lt.u32.totalorder %s884_s16, %s1209_s3 }
  0x69   : > { %p886_p10 = pnand %p885_p4, %p1274_p9 }
  0x6a   : > { %p891_p5 = por %p890_p2, %p889_p1 }
  0x6b   : > { %p887_p12 = pneg %p886_p10 }
  0x6c   : > { %p893_p11 = por %p892_p8, %p891_p5 }
  0x6e   : > { %p894_p0 = pnand %p893_p11, %p887_p12 }
  0x70   : > { %897 = shalt.err (!%p894_p0)
}
  0x71   : > { %s958_s28 = smov 64   ;;  %s959_s18 = smov 128  }
  0x72   : > { %s960_s27 = smov 4  }
  0x73   : > { %775 = dma.vmem_to_hbm [thread:$0]  (%p1274_p9), %s1213_s30, 2048, %s1209_s3, %s499_s4, %s958_s28, %s959_s18, %s960_s27  }
  0x74 PF: > { %s529_s29 = sand.u32 1, %s932_s6   ;;  %p1275_p7 = scmp.ne.s32.totalorder %s1270_s21, 0 }
  0x75   : > { %p1276_p13 = scmp.ge.s32.totalorder %s952_s11, 2  ;;  %s530_s9 = scalar_lea.sflag [#allocation4], %s529_s29 }
  0x77   : > { %p782_p3 = pnand %p1276_p13, %p1275_p7 }
  0x79   : > { %927 = dma.done.wait (!%p782_p3), %s530_s9, 2048  }
  0x7a   : > { %929 = vsyncadd (!%p782_p3), %s530_s9, 4294965248  ;;  %s17_s11 = sadd.s32 1, %s952_s11   ;;  %s1277_s6 = smov %s936_s7 }
  0x7b   : > { %p14_p6 = scmp.ge.s32.totalorder %s17_s11, 4   ;;  %s1278_s7 = smov %s940_s8 }
  0x7c   : > { %s1279_s8 = smov %s1027_s20  ;;  %s1280_s9 = smov %s948_s10 }
  0x7d   : > { %s1281_s10 = smov %s1283_s14  ;;  %16 = sbr.rel (!%p14_p6) target bundleno = 6 (0x6), region = 69 }
  0x84   :  { %535 = vsyncpa [#allocation3], 1 }
  0x85   :  { %537 = vsyncpa [#allocation3 + $0x1], 1 }
  0x86   :  { %538 = vsyncpa [#allocation4], 1 }
  0x87   :  { %540 = vsyncpa [#allocation4 + $0x1], 1 }

</bundles_post_ra>
